<compile_context>
chip_gen: v5e
topology: v5e:2x2
jax: 0.10.0
libtpu: 0.0.40
codegen_flags: <defaults>
</compile_context>

<pallas_src>
import jax
import jax.numpy as jnp
from jax import lax
from jax.experimental import pallas as pl
from jax.experimental.pallas import tpu as pltpu


# -----------------------------------------------------------------------------
# Tile-size helpers
# -----------------------------------------------------------------------------
def _pick_row_tile(m, target=1024):
    """Row tile: multiple of 8 (or full extent), <= target.

    Prefers an EVEN number of grid steps so the single 'parallel' row axis
    shards evenly across v7x's 2 TensorCores (no effect on v5e/v6e).
    """
    if m <= 8 or m % 8 != 0:
        return m                       # full extent (satisfies tiling rule)
    if m <= target:
        half = m // 2
        if half >= 16 and half % 8 == 0:
            return half                # 2 even steps -> both v7x TCs busy
        return m                       # tiny problem: single tile
    steps = -(-m // target)            # ceil
    if steps % 2 == 1:
        steps += 1                     # even step count for v7x
    tm = -(-m // steps)
    tm = ((tm + 7) // 8) * 8
    return min(tm, target)


def _pick_lane_tile(n, target=512):
    """Lane tile: always a multiple of 128 (unless n < 128); <= target.

    Never falls back to a ragged full extent -- pl.cdiv handles the ragged
    last block.  target=512 keeps input_proj inside v5e's 16 MiB default
    scoped-VMEM limit and leaves >45% headroom on v7x's 64 MiB at C=2048.
    """
    if n <= 128:
        return n
    return (min(target, n) // 128) * 128


# -----------------------------------------------------------------------------
# Kernel 1: 1x1 conv (input_proj) in native NCHW layout:
#   o[:, hw_tile] = W^T @ x[:, hw_tile] + b     (W^T: (D, C), x: (C, HW))
# -----------------------------------------------------------------------------
def _input_proj_kernel(x_ref, wt_ref, b_ref, o_ref):
    x = x_ref[...].astype(jnp.bfloat16)                       # (C, t_hw)
    o_ref[...] = (
        jnp.dot(wt_ref[...], x, preferred_element_type=jnp.float32)  # (D, t_hw)
        + b_ref[...]                                          # (D, 1) broadcast
    )


def input_proj_nchw(src_nchw, w, b, *, tile_hw_target=512):
    """src_nchw: (B, C, H, W) f32 or bf16; w: (C, D); b: (1, D) -> (B, D, H, W) f32."""
    B, C, H, W = src_nchw.shape
    D = w.shape[1]
    HW = H * W
    x = src_nchw.reshape(B, C, HW)                 # free reshape, no transpose
    wt = jnp.transpose(w).astype(jnp.bfloat16)     # (D, C) tiny weight
    b_col = b.reshape(D, 1)
    t_hw = _pick_lane_tile(HW, tile_hw_target)
    grid = (B, pl.cdiv(HW, t_hw))

    cost = pl.CostEstimate(
        flops=2 * B * HW * C * D,
        transcendentals=0,
        bytes_accessed=(B * C * HW * src_nchw.dtype.itemsize
                        + B * D * HW * 4 + D * C * 2 + D * 4),
    )

    out = pl.pallas_call(
        _input_proj_kernel,
        out_shape=jax.ShapeDtypeStruct((B, D, HW), jnp.float32),
        grid_spec=pltpu.PrefetchScalarGridSpec(
            num_scalar_prefetch=0,
            grid=grid,
            in_specs=[
                pl.BlockSpec((None, C, t_hw), lambda bi, j: (bi, 0, j)),
                pl.BlockSpec((D, C), lambda bi, j: (0, 0)),
                pl.BlockSpec((D, 1), lambda bi, j: (0, 0)),
            ],
            out_specs=pl.BlockSpec((None, D, t_hw), lambda bi, j: (bi, 0, j)),
        ),
        compiler_params=pltpu.CompilerParams(
            dimension_semantics=("parallel", "parallel")),
        cost_estimate=cost,
    )(x, wt, b_col)
    return out.reshape(B, D, H, W)


# -----------------------------------------------------------------------------
# Kernel 2: FUSED detection heads on hs rows (reads each hs tile once):
#   y      = hs @ [Wc | W1 | Wq] + [bc | b1 | bq]       (one wide MXU pass)
#   logits = y[:, :NC1]
#   boxes  = sigmoid(relu(relu(y[:, NC1:NC1+D]) @ W2 + b2) @ W3 + b3)
#   projq  = l2norm(y[:, NC1+D:])
# Stored into one lane-dense slab [logits | projq | boxes | pad].
# -----------------------------------------------------------------------------
def _make_fused_heads_kernel(nc1, dmodel, hc):
    def kernel(hs_ref, wcat_ref, bcat_ref, w2_ref, b2_ref, w3_ref, b3_ref,
               out_ref):
        h = hs_ref[...].astype(jnp.bfloat16)       # bf16 MXU operands

        # single wide MXU pass over h (class | bbox-layer1 | ca-image-proj)
        y = (jnp.dot(h, wcat_ref[...], preferred_element_type=jnp.float32)
             + bcat_ref[...])
        logits = y[:, :nc1]
        x1 = jnp.maximum(y[:, nc1:nc1 + dmodel], 0.0)
        q = y[:, nc1 + dmodel:nc1 + dmodel + hc]

        # bbox_embed MLP layers 2 & 3 (activations kept in f32)
        x2 = jnp.maximum(
            jnp.dot(x1.astype(jnp.bfloat16), w2_ref[...],
                    preferred_element_type=jnp.float32) + b2_ref[...], 0.0)
        boxes = jax.nn.sigmoid(
            jnp.dot(x2.astype(jnp.bfloat16), w3_ref[...],
                    preferred_element_type=jnp.float32) + b3_ref[...])

        # contrastive_align image projection L2 normalize (rsqrt -> EUP slot)
        inv = lax.rsqrt(jnp.maximum(jnp.sum(q * q, axis=-1, keepdims=True),
                                    1e-24))
        qn = q * inv

        # Direct slice stores (no concatenate temp, no per-step zero pad).
        # NOTE: pad columns of the slab are intentionally left uninitialized;
        # the wrapper slices them off -- keep that invariant.
        out_ref[:, 0:nc1] = logits
        out_ref[:, nc1:nc1 + hc] = qn
        out_ref[:, nc1 + hc:nc1 + hc + 4] = boxes

    return kernel


def fused_detection_heads(hs_flat, params, *, tile_m_target=1024):
    """hs_flat: (M, D) -> (logits (M, NC1), boxes (M, 4), proj_queries (M, Hc))."""
    M, D = hs_flat.shape
    wc = params["class_w"]; bc = params["class_b"]
    w1 = params["bbox_w1"]; b1 = params["bbox_b1"]
    w2 = params["bbox_w2"].astype(jnp.bfloat16); b2 = params["bbox_b2"]
    w3 = params["bbox_w3"].astype(jnp.bfloat16); b3 = params["bbox_b3"]
    wq = params["ca_img_w"]; bq = params["ca_img_b"]
    NC1 = wc.shape[1]
    Hc = wq.shape[1]

    # Fuse the three hs-consuming weights into one wide bf16 matrix.
    # Column boundaries are 0 / NC1 / NC1+D (128-aligned at real MDETR scale).
    w_cat = jnp.concatenate([wc, w1, wq], axis=1).astype(jnp.bfloat16)  # (D, NC1+D+Hc)
    b_cat = jnp.concatenate([bc, b1, bq], axis=1)                       # (1, NC1+D+Hc)
    NCAT = NC1 + D + Hc

    width = NC1 + Hc + 4
    pad_w = ((width + 127) // 128) * 128
    tm = _pick_row_tile(M, tile_m_target)
    grid = (pl.cdiv(M, tm),)

    cost = pl.CostEstimate(
        flops=2 * M * D * NCAT + 2 * M * D * D + 2 * M * D * 4,
        transcendentals=5 * M,                     # sigmoid(4) + rsqrt
        bytes_accessed=(M * D * 4 + M * pad_w * 4
                        + 2 * (D * NCAT + D * D + D * 4) + 4 * (NCAT + D + 4)),
    )

    full = lambda shape: pl.BlockSpec(shape, lambda i, _s=shape: (0,) * len(_s))
    packed = pl.pallas_call(
        _make_fused_heads_kernel(NC1, D, Hc),
        out_shape=jax.ShapeDtypeStruct((M, pad_w), jnp.float32),
        grid_spec=pltpu.PrefetchScalarGridSpec(
            num_scalar_prefetch=0,
            grid=grid,
            in_specs=[
                pl.BlockSpec((tm, D), lambda i: (i, 0)),
                full(w_cat.shape), full(b_cat.shape),
                full(w2.shape), full(b2.shape),
                full(w3.shape), full(b3.shape),
            ],
            out_specs=pl.BlockSpec((tm, pad_w), lambda i: (i, 0)),
        ),
        compiler_params=pltpu.CompilerParams(dimension_semantics=("parallel",)),
        cost_estimate=cost,
    )(hs_flat, w_cat, b_cat, w2, b2, w3, b3)

    # Slab layout: [logits | proj_q | boxes | pad] (pad columns are garbage).
    logits = packed[:, :NC1]
    proj_q = packed[:, NC1:NC1 + Hc]
    boxes = packed[:, NC1 + Hc:NC1 + Hc + 4]
    return logits, boxes, proj_q


# -----------------------------------------------------------------------------
# Kernel 3: contrastive-align text projection: Linear then L2 normalize (dim=-1)
# (matches torch.nn.functional.normalize(p=2, dim=-1, eps=1e-12))
# At real scale M = T*B is small, so the grid defaults to a single tile.
# TODO(synk): could be folded into the fused-heads call as a fourth weight
#             segment + second slab region; kept separate for clarity.
# -----------------------------------------------------------------------------
def _proj_norm_kernel(x_ref, w_ref, b_ref, o_ref):
    x = x_ref[...].astype(jnp.bfloat16)
    y = jnp.dot(x, w_ref[...], preferred_element_type=jnp.float32) + b_ref[...]
    inv = lax.rsqrt(jnp.maximum(jnp.sum(y * y, axis=-1, keepdims=True), 1e-24))
    o_ref[...] = y * inv


def project_and_normalize(x_flat, w, b, *, tile_m_target=1024):
    """x_flat: (M, D); w: (D, H); b: (1, H) -> (M, H), unit L2 rows."""
    M, D = x_flat.shape
    H = w.shape[1]
    wb = w.astype(jnp.bfloat16)
    tm = M if M <= tile_m_target else _pick_row_tile(M, tile_m_target)
    grid = (pl.cdiv(M, tm),)
    return pl.pallas_call(
        _proj_norm_kernel,
        out_shape=jax.ShapeDtypeStruct((M, H), jnp.float32),
        grid_spec=pltpu.PrefetchScalarGridSpec(
            num_scalar_prefetch=0,
            grid=grid,
            in_specs=[
                pl.BlockSpec((tm, D), lambda i: (i, 0)),
                pl.BlockSpec((D, H), lambda i: (0, 0)),
                pl.BlockSpec((1, H), lambda i: (0, 0)),
            ],
            out_specs=pl.BlockSpec((tm, H), lambda i: (i, 0)),
        ),
        compiler_params=pltpu.CompilerParams(dimension_semantics=("parallel",)),
    )(x_flat, wb, b)


# -----------------------------------------------------------------------------
# MDETR wrapper (parameter init + forward glue)
# -----------------------------------------------------------------------------
def init_params(key, *, backbone_channels, hidden_dim, num_classes, num_queries,
                contrastive_hdim):
    keys = jax.random.split(key, 16)
    scale = 0.02

    def lin(k, n_in, n_out):
        kw, kb = jax.random.split(k)
        w = scale * jax.random.normal(kw, (n_in, n_out), jnp.float32)
        b = scale * jax.random.normal(kb, (1, n_out), jnp.float32)
        return w, b

    p = {}
    p["proj_w"], p["proj_b"] = lin(keys[0], backbone_channels, hidden_dim)
    p["class_w"], p["class_b"] = lin(keys[1], hidden_dim, num_classes + 1)
    p["bbox_w1"], p["bbox_b1"] = lin(keys[2], hidden_dim, hidden_dim)
    p["bbox_w2"], p["bbox_b2"] = lin(keys[3], hidden_dim, hidden_dim)
    p["bbox_w3"], p["bbox_b3"] = lin(keys[4], hidden_dim, 4)
    p["query_embed"] = scale * jax.random.normal(
        keys[5], (num_queries, hidden_dim), jnp.float32)
    p["ca_img_w"], p["ca_img_b"] = lin(keys[6], hidden_dim, contrastive_hdim)
    p["ca_txt_w"], p["ca_txt_b"] = lin(keys[7], hidden_dim, contrastive_hdim)
    return p


def mdetr_forward(params, src_nchw, hs, text_memory, *, aux_loss=True,
                  contrastive_align_loss=True):
    """
    src_nchw    : (B, C, H, W)  backbone feature map (NCHW, PyTorch convention)
    hs          : (L, B, Q, D)  transformer decoder output (all decoder layers)
    text_memory : (T, B, D)     transformer text memory
    Returns dict mirroring MDETR.forward(encode_and_save=False), plus the
    projected image features from the encode path's input_proj.
    """
    B, C, H, W = src_nchw.shape
    L, _, Q, D = hs.shape
    T = text_memory.shape[0]

    # --- encode path: input_proj (1x1 conv), native NCHW layout ------------
    src_proj = input_proj_nchw(src_nchw, params["proj_w"], params["proj_b"])

    # --- decode path: fused heads on hs (single pallas_call over hs rows) --
    # (contrastive image projection is always produced by the fused kernel;
    #  it is simply dropped if contrastive_align_loss is False.)
    hs_flat = hs.reshape(L * B * Q, D)
    logits_flat, boxes_flat, pq_flat = fused_detection_heads(hs_flat, params)
    outputs_class = logits_flat.reshape(L, B, Q, -1)
    outputs_coord = boxes_flat.reshape(L, B, Q, 4)

    out = {
        "pred_logits": outputs_class[-1],
        "pred_boxes": outputs_coord[-1],
        "input_proj_src": src_proj,
        "query_embed": params["query_embed"],
    }

    proj_queries = None
    proj_tokens = None
    if contrastive_align_loss:
        proj_queries = pq_flat.reshape(L, B, Q, -1)
        txt_flat = text_memory.reshape(T * B, D)
        pt_flat = project_and_normalize(txt_flat, params["ca_txt_w"],
                                        params["ca_txt_b"])
        # .transpose(0, 1): (T, B, H) -> (B, T, H)
        proj_tokens = jnp.transpose(pt_flat.reshape(T, B, -1), (1, 0, 2))
        out["proj_queries"] = proj_queries[-1]
        out["proj_tokens"] = proj_tokens

    if aux_loss:
        aux = []
        for l in range(L - 1):
            d = {"pred_logits": outputs_class[l], "pred_boxes": outputs_coord[l]}
            if contrastive_align_loss:
                d["proj_queries"] = proj_queries[l]
                d["proj_tokens"] = proj_tokens
            aux.append(d)
        out["aux_outputs"] = aux

    return out


if __name__ == "__main__":
    # Small deterministic shapes.
    B, C_backbone, H, W = 2, 4, 16, 16      # backbone feature map
    hidden_dim = 32                         # transformer.d_model
    num_classes = 7                         # -> class head outputs 8
    num_queries = 16
    num_dec_layers = 2
    contrastive_hdim = 64
    T_text = 8                              # text tokens

    key = jax.random.PRNGKey(0)
    k_par, k_src, k_hs, k_txt = jax.random.split(key, 4)

    params = init_params(
        k_par,
        backbone_channels=C_backbone,
        hidden_dim=hidden_dim,
        num_classes=num_classes,
        num_queries=num_queries,
        contrastive_hdim=contrastive_hdim,
    )

    # f32 inputs to match the PyTorch reference; input_proj_nchw also accepts
    # bf16 src directly (no wrapper cast) if the backbone emits bf16.
    src = jax.random.normal(k_src, (B, C_backbone, H, W), jnp.float32)
    hs = jax.random.normal(k_hs, (num_dec_layers, B, num_queries, hidden_dim),
                           jnp.float32)
    text_memory = jax.random.normal(k_txt, (T_text, B, hidden_dim), jnp.float32)

    out = mdetr_forward(params, src, hs, text_memory,
                        aux_loss=True, contrastive_align_loss=True)

    jax.block_until_ready(out["pred_logits"])
    jax.block_until_ready(out["pred_boxes"])
    jax.block_until_ready(out["proj_queries"])
    jax.block_until_ready(out["proj_tokens"])
    jax.block_until_ready(out["input_proj_src"])

    assert out["pred_logits"].shape == (B, num_queries, num_classes + 1)
    assert out["pred_boxes"].shape == (B, num_queries, 4)
    assert out["proj_queries"].shape == (B, num_queries, contrastive_hdim)
    assert out["proj_tokens"].shape == (B, T_text, contrastive_hdim)
    assert out["input_proj_src"].shape == (B, hidden_dim, H, W)

    # Sanity: bbox coords in (0,1) via sigmoid, proj rows ~unit L2 norm.
    assert bool(jnp.all(out["pred_boxes"] > 0.0)) and bool(jnp.all(out["pred_boxes"] < 1.0))
    norms = jnp.linalg.norm(out["proj_tokens"], axis=-1)
    assert bool(jnp.all(jnp.abs(norms - 1.0) < 1e-2))

    print("KERNEL_OK")
</pallas_src>

<mosaic_0001>
module attributes {stable_mosaic.version = 11 : i64} {
  func.func @_input_proj_kernel(%arg0: i32, %arg1: i32, %arg2: memref<1x4x256xf32, #tpu.memory_space<vmem>>, %arg3: memref<32x4xbf16, #tpu.memory_space<vmem>>, %arg4: memref<32x1xf32, #tpu.memory_space<vmem>>, %arg5: memref<1x32x256xf32, #tpu.memory_space<vmem>>) attributes {dimension_semantics = [#tpu.dimension_semantics<parallel>, #tpu.dimension_semantics<parallel>], iteration_bounds = array<i64: 2, 1>, scalar_prefetch = 0 : i64, scratch_operands = 0 : i64, tpu.core_type = #tpu.core_type<tc>, window_params = [{transform_indices = @transform_0, window_bounds = array<i64: 1, 4, 256>}, {pipeline_mode = #tpu.pipeline_mode<synchronous>, transform_indices = @transform_1, window_bounds = array<i64: 32, 4>}, {pipeline_mode = #tpu.pipeline_mode<synchronous>, transform_indices = @transform_2, window_bounds = array<i64: 32, 1>}, {transform_indices = @transform_3, window_bounds = array<i64: 1, 32, 256>}]} {
    %c0 = arith.constant 0 : index
    %c0_0 = arith.constant 0 : index
    %c0_1 = arith.constant 0 : index
    %0 = vector.load %arg2[%c0, %c0_0, %c0_1] : memref<1x4x256xf32, #tpu.memory_space<vmem>>, vector<1x4x256xf32>
    %1 = vector.shape_cast %0 : vector<1x4x256xf32> to vector<4x256xf32>
    %2 = arith.truncf %1 : vector<4x256xf32> to vector<4x256xbf16>
    %c0_2 = arith.constant 0 : index
    %c0_3 = arith.constant 0 : index
    %3 = vector.load %arg3[%c0_2, %c0_3] : memref<32x4xbf16, #tpu.memory_space<vmem>>, vector<32x4xbf16>
    %cst = arith.constant dense<0.000000e+00> : vector<32x256xf32>
    %4 = tpu.matmul %3, %2, %cst {dimension_numbers = #tpu.dot_dimension_numbers<[1], [0], [0], [1], [0, 0, 1, 1], [], []>} : vector<32x4xbf16>, vector<4x256xbf16>, vector<32x256xf32> -> vector<32x256xf32>
    %c0_4 = arith.constant 0 : index
    %c0_5 = arith.constant 0 : index
    %5 = vector.load %arg4[%c0_4, %c0_5] : memref<32x1xf32, #tpu.memory_space<vmem>>, vector<32x1xf32>
    %6 = vector.broadcast %5 : vector<32x1xf32> to vector<32x256xf32>
    %7 = arith.addf %4, %6 : vector<32x256xf32>
    %c0_6 = arith.constant 0 : index
    %c0_7 = arith.constant 0 : index
    %c0_8 = arith.constant 0 : index
    %8 = vector.load %arg5[%c0_6, %c0_7, %c0_8] : memref<1x32x256xf32, #tpu.memory_space<vmem>>, vector<1x32x256xf32>
    %9 = vector.shape_cast %8 : vector<1x32x256xf32> to vector<32x256xf32>
    %10 = vector.shape_cast %7 : vector<32x256xf32> to vector<1x32x256xf32>
    tpu.vector_store %arg5[%c0_6, %c0_7, %c0_8], %10 {strides = array<i32>} : memref<1x32x256xf32, #tpu.memory_space<vmem>>, vector<1x32x256xf32>,
    return
  }
  func.func @transform_0(%arg0: i32, %arg1: i32) -> (i32, i32, i32) {
    %c0_i32 = arith.constant 0 : i32
    %c0_i32_0 = arith.constant 0 : i32
    return %arg0, %c0_i32, %arg1 : i32, i32, i32
  }
  func.func @transform_1(%arg0: i32, %arg1: i32) -> (i32, i32) {
    %c0_i32 = arith.constant 0 : i32
    %c0_i32_0 = arith.constant 0 : i32
    %c0_i32_1 = arith.constant 0 : i32
    return %c0_i32, %c0_i32_0 : i32, i32
  }
  func.func @transform_2(%arg0: i32, %arg1: i32) -> (i32, i32) {
    %c0_i32 = arith.constant 0 : i32
    %c0_i32_0 = arith.constant 0 : i32
    %c0_i32_1 = arith.constant 0 : i32
    return %c0_i32, %c0_i32_0 : i32, i32
  }
  func.func @transform_3(%arg0: i32, %arg1: i32) -> (i32, i32, i32) {
    %c0_i32 = arith.constant 0 : i32
    %c0_i32_0 = arith.constant 0 : i32
    return %arg0, %c0_i32, %arg1 : i32, i32, i32
  }
}

</mosaic_0001>

<bundles_post_ra>
// kernel: tpu_custom_call.1
= control target key start
LH: loop header
LB: loop body
LE: loop exit
PB: predicated region body
PF: predicated region fallthrough
CT: control target
= control target key end

     0   :  { %8 = vsyncpa [#allocation3], 0  ;;  %s718_s0 = inlined_call_operand.vmem [shape: f32[2,4,256], index: 0, kind: input, shape index: {}]   ;;  %s719_s1 = inlined_call_operand.vmem [shape: bf16[32,4], index: 1, kind: input, shape index: {}]   ;;  %s720_s2 = inlined_call_operand.vmem [shape: f32[32,1], index: 2, kind: input, shape index: {}]   ;;  %s721_s3 = inlined_call_operand.hbm [shape: f32[2,32,256], index: 3, kind: output, shape index: {}]  }
   0x1   :  { %10 = vsyncpa [#allocation3 + $0x1], 0  ;;  %s599_s12 = smov 0   ;;  %s601_s13 = smov 0  }
   0x2   :  { %s603_s14 = smov 0   ;;  %s605_s15 = smov 0  }
   0x3   :  { %s607_s16 = smov 0   ;;  %s609_s17 = smov 0  }
   0x4 LB: > { %s405_s18 = sadd.s32 4294967295, %s574_s17   ;;  %s406_s19 = sadd.s32 4294967294, %s574_s17   ;;  %s574_s17 = sphi %s609_s17, %s16_s17   ;;  %s570_s16 = sphi %s607_s16, %s728_s16   ;;  %s566_s15 = sphi %s605_s15, %s727_s15   ;;  %s562_s14 = sphi %s603_s14, %s726_s14   ;;  %s558_s13 = sphi %s601_s13, %s725_s13   ;;  %s554_s12 = sphi %s599_s12, %s724_s12  }
   0x5   : > { %s28_s20 = sadd.s32 1, %s570_s16  ;;  %s107_s21 = sadd.s32 1, %s562_s14 }
   0x6   : > { %p30_p0 = scmp.ge.s32.totalorder %s28_s20, 2  ;;  %p117_p1 = scmp.ne.s32.totalorder %s562_s14, %s558_s13 }
   0x7   : > { %p118_p2 = scmp.eq.s32.totalorder %s405_s18, 1  ;;  %p123_p3 = scmp.ne.s32.totalorder %s558_s13, %s554_s12 }
   0x8   : > { %s730_s20 = smov (%p30_p0, %s28_s20), 0  ;;  %p124_p5 = scmp.eq.s32.totalorder %s406_s19, 1 }
   0x9   : > { %p639_p4 = por %p118_p2, %p117_p1  ;;  %s102_s23 = ssub.s32 %s570_s16, %s730_s20 }
   0xa   : > { %p409_p6 = scmp.ge.s32.totalorder %s574_s17, 1  ;;  %p105_p7 = scmp.eq.s32.totalorder %s102_s23, 0 }
   0xb   : > { %p646_p8 = por %p124_p5, %p123_p3  ;;  %p161_p9 = scmp.lt.s32.totalorder %s574_s17, 3 }
   0xc   : > { %s652_s25 = scalar_select %p105_p7, %s562_s14, %s107_s21  }
   0xd   : > { %p162_p10 = pnand %p409_p6, %p161_p9 }
   0xe   : > { %p190_p11 = scmp.lt.s32.totalorder (!%p162_p10), %s566_s15, 1  ;;  %s186_s26 = sand.u32 (!%p162_p10), 1, %s558_s13  }
   0xf   : > { %165 = sbr.rel (%p162_p10) target bundleno = 186 (0xba), region = 32  ;;  %s410_s27 = sshll.u32 (!%p162_p10), %s186_s26, 6 }
  0x10   : > { %s188_s28 = scalar_lea.vmem (!%p162_p10), [#allocation2], %s410_s27  ;;  %s433_s29 = sshll.u32 (!%p162_p10), %s566_s15, 6 }
  0x11   : > { %s322_s5 = scalar_lea.hbm (!%p162_p10), %s721_s3, %s433_s29  ;;  %s323_s6 = sshll.u32 (!%p162_p10), %s188_s28, 4  ;;  %s324_s6 = int_to_ptr.vmem [resolvable:$true] %s323_s6 }
  0x12   : > { %s516_s18 = scalar_lea.hbm (!%p162_p10), %s721_s3, 128 }
  0x14   : > { %v576_v0 = vmov 0   ;;  %v216_v1 = vld [vmem:[%s720_s2 + $0x10] sm:$0xff]  ;;  %v214_v2 = vld [vmem:[%s720_s2] sm:$0xff]  ;;  %s191_s30 = scalar_select %p190_p11, %s566_s15, 1  ;;  %v217_v4 = vld [vmem:[%s720_s2 + $0x18] sm:$0xff]  ;;  %vm255_vm0 = vcmask 1041408  }
  0x15   : > { %495 = vset.pattern.permute.xlu1 %v576_v0  ;;  %494 = vset.pattern.permute.xlu0 %v576_v0  ;;  %v215_v5 = vld [vmem:[%s720_s2 + $0x8] sm:$0xff]  ;;  %v431_v12 = vld [vmem:[%s719_s1] sm:$0xff]  ;;  %vm248_vm1 = vcmask 31744   ;;  %s325_s15 = sshll.u32 %s322_s5, 4  ;;  %s326_s15 = int_to_ptr.hbm [resolvable:$true] %s325_s15 }
  0x16   : > { %230 = vperm.xlu1 %495, %v216_v1   ;;  %220 = vperm.xlu0 %494, %v214_v2   ;;  %s430_s4 = sshll.u32 %s191_s30, 3  ;;  %v432_v13 = vld [vmem:[%s719_s1 + $0x8] sm:$0xff]  ;;  %s510_s8 = sshra.s32 %s326_s15, 4  ;;  %s511_s8 = int_to_ptr.hbm [resolvable:$true] %s510_s8 }
  0x17   : > { %s197_s7 = scalar_lea.vmem %s718_s0, %s430_s4  ;;  %s512_s9 = scalar_lea.hbm %s511_s8, 64 }
  0x18   : > { %v201_v3 = vld [vmem:[%s197_s7] sm:$0xff]  ;;  %s309_s7 = scalar_lea.sflag [#allocation3], %s186_s26  ;;  %p513_p12 = scmp.ne.s32.totalorder %s511_s8, %s512_s9 }
  0x19   : > { %203 = vst [vmem:[#allocation1] ss:$2 sm:$0xff] %v201_v3  ;;  %p517_p1 = scmp.lt.s32.totalorder %s511_s8, %s721_s3  ;;  %p518_p2 = scmp.lt.s32.totalorder %s516_s18, %s512_s9 }
  0x1a   : > { %p514_p13 = pnand %p513_p12, %p639_p4 }
  0x1b   : > { %p519_p3 = por %p518_p2, %p517_p1 }
  0x1c   : > { %p515_p0 = pneg %p514_p13 }
  0x1e   : > { %235 = vperm.xlu1 %495, %v217_v4   ;;  %225 = vperm.xlu0 %494, %v215_v5   ;;  %p520_p5 = pnand %p519_p3, %p515_p0 }
  0x20   : > { %v204_v6 = vld.sshfl [vmem:[#allocation1] sm:$0xff pattern:$0x75316420]  ;;  %v205_v7 = vld.sshfl [vmem:[#allocation1 + $0x8] sm:$0xff pattern:$0x75316420] }
  0x21   : > { %v208_v8 = vpack.c.bf16 %v204_v6, %v204_v6  ;;  %v209_v9 = vpack.c.bf16 %v205_v7, %v205_v7 }
  0x23   : > { %v257_v10 = vsel %vm255_vm0, %v208_v8, 0  ;;  %v260_v11 = vsel %vm255_vm0, %v209_v9, 0 }
  0x24   : > { %269 = vmatpush.bf16.msra.mxu0 %v257_v10  ;;  %434 = vmatpush.bf16.msra.mxu2 %v257_v10 }
  0x25   : > { %288 = vmatpush.bf16.msra.mxu1 %v260_v11  ;;  %435 = vmatpush.bf16.msra.mxu3 %v260_v11 }
  0x27   : > { %421 = vmatmul.msk.bf16.vlgmr.msra.gmra.mxu0 %vm248_vm1, %v431_v12  ;;  %422 = vmatmul.msk.bf16.vlgmr.msra.gmra.mxu2 %vm248_vm1, %v432_v13 }
  0x28   : > { %423 = vmatmul.msk.bf16.vlgmr.msra.gmra.mxu1 %vm248_vm1, %v431_v12  ;;  %424 = vmatmul.msk.bf16.vlgmr.msra.gmra.mxu3 %vm248_vm1, %v432_v13 }
  0x88   : > { %v221_v14 = vpop.permute.xlu0 %220  ;;  %v231_v19 = vpop.permute.xlu1 %230 }
  0x90   : > { %v226_v23 = vpop.permute.xlu0 %225  ;;  %v236_v29 = vpop.permute.xlu1 %235 }
  0xa4   : > { %v271_v15 = vpop.f32.mrf.mxu0 }
  0xa5   : > { %v272_v16 = vadd.f32 %v271_v15, %v221_v14  ;;  %v290_v17 = vpop.f32.mrf.mxu1 }
  0xa6   : > { %v291_v18 = vadd.f32 %v290_v17, %v221_v14 }
  0xa7   : > { %300 = vst [vmem:[%s188_s28] sm:$0xff] %v272_v16 }
  0xa8   : > { %301 = vst [vmem:[%s188_s28 + $0x8] sm:$0xff] %v291_v18 }
  0xaa   : > { %v276_v20 = vpop.f32.mrf.mxu2 }
  0xab   : > { %v277_v21 = vadd.f32 %v276_v20, %v231_v19  ;;  %v295_v22 = vpop.f32.mrf.mxu3 }
  0xac   : > { %v296_v24 = vadd.f32 %v295_v22, %v231_v19  ;;  %v273_v25 = vpop.f32.mrf.mxu0 }
  0xad   : > { %304 = vst [vmem:[%s188_s28 + $0x20] sm:$0xff] %v277_v21  ;;  %v274_v26 = vadd.f32 %v273_v25, %v226_v23  ;;  %v292_v27 = vpop.f32.mrf.mxu1 }
  0xae   : > { %305 = vst [vmem:[%s188_s28 + $0x28] sm:$0xff] %v296_v24  ;;  %v293_v28 = vadd.f32 %v292_v27, %v226_v23 }
  0xaf   : > { %302 = vst [vmem:[%s188_s28 + $0x10] sm:$0xff] %v274_v26 }
  0xb0   : > { %303 = vst [vmem:[%s188_s28 + $0x18] sm:$0xff] %v293_v28 }
  0xb2   : > { %v278_v30 = vpop.f32.mrf.mxu2 }
  0xb3   : > { %v279_v31 = vadd.f32 %v278_v30, %v236_v29  ;;  %v297_v32 = vpop.f32.mrf.mxu3 }
  0xb4   : > { %v298_v33 = vadd.f32 %v297_v32, %v236_v29 }
  0xb5   : > { %306 = vst [vmem:[%s188_s28 + $0x30] sm:$0xff] %v279_v31 }
  0xb6   : > { %307 = vst [vmem:[%s188_s28 + $0x38] sm:$0xff] %v298_v33 }
  0xb7   : > { %523 = shalt.err (!%p520_p5)
}
  0xb8   : > { %s577_s23 = smov 256   ;;  %s578_s26 = smov 16  }
  0xb9   : > { %436 = dma.vmem_to_hbm [thread:$0]  (%p639_p4), %s324_s6, 1024, %s326_s15, %s309_s7, %s577_s23, %s577_s23, %s578_s26  }
  0xba PF: > { %p442_p6 = scmp.ge.s32.totalorder %s574_s17, 2  ;;  %s340_s27 = sand.u32 1, %s554_s12  }
  0xbb   : > { %s341_s28 = scalar_lea.sflag [#allocation3], %s340_s27 }
  0xbc   : > { %p439_p7 = pnand %p442_p6, %p646_p8 }
  0xbe   : > { %p440_p9 = pneg %p439_p7 }
  0xc0   : > { %549 = dma.done.wait (%p440_p9), %s341_s28, 1024  }
  0xc1   : > { %551 = vsyncadd (%p440_p9), %s341_s28, 4294966272  ;;  %s16_s17 = sadd.s32 1, %s574_s17   ;;  %s724_s12 = smov %s558_s13 }
  0xc2   : > { %p13_p10 = scmp.ge.s32.totalorder %s16_s17, 4   ;;  %s725_s13 = smov %s562_s14 }
  0xc3   : > { %s726_s14 = smov %s652_s25  ;;  %s727_s15 = smov %s570_s16 }
  0xc4   : > { %s728_s16 = smov %s730_s20  ;;  %15 = sbr.rel (!%p13_p10) target bundleno = 4 (0x4), region = 67 }
  0xc9   :  { %347 = vsyncpa [#allocation3], 1 }
  0xca   :  { %349 = vsyncpa [#allocation3 + $0x1], 1 }

</bundles_post_ra>
